<compile_context>
chip_gen: v6e
topology: v6e:2x2x1
jax: 0.10.0
libtpu: 0.0.40
codegen_flags: <defaults>
</compile_context>

<pallas_src>
from functools import partial

import jax
import jax.numpy as jnp
from jax import lax
from jax.experimental import pallas as pl
from jax.experimental.pallas import tpu as pltpu

K = 3                               # 3x3 convs
HALO = 2                            # receptive-field halo of two stacked 3x3s
_PICK_BUDGET = 28 * 1024 * 1024     # strip-sizing budget (safe for v7x 64 MiB)
_VMEM_LIMIT = 44 * 1024 * 1024      # raised above the 32 MiB scoped default


def _make_ccn_kernel(TH, W, Cin, CH, num_strips, compute_dtype):
    """Fused conv3x3+ReLU -> conv3x3+ReLU -> conv1x1 on one TH-row strip."""
    Wp = W + 2 * HALO               # padded input width
    W1 = W + 2                      # conv1 output width (includes conv2 halo)

    def kernel(x_ref,               # (TH+4, Cin, Wp)  halo'd input strip (auto-pipelined)
               w1_ref, b1_ref,      # (K, CH, K*Cin),  (CH, 1)
               w2_ref, b2_ref,      # (K, CH, K*CH),   (CH, 1)
               w3_ref, b3_ref,      # (1, CH),         (1, 1)
               o_ref,               # (TH, W) density strip (lane-dense)
               h1_ref):             # (TH+2, CH, W1) conv1 activations, VMEM scratch
        strip_i = pl.program_id(0) % num_strips       # strip position in image

        w1 = w1_ref[...]
        b1 = b1_ref[...]
        w2 = w2_ref[...]
        b2 = b2_ref[...]
        w3 = w3_ref[...]
        b3 = b3_ref[...]

        # ---- layer 1: 3x3 conv (Cin -> CH) + ReLU, one row per iteration.
        # (ky, ci) folded into a depth-(K*Cin) contraction via a sublane
        # collapse-reshape; kx handled by lane-shifting the matmul outputs.
        def conv1_row(yp, carry):
            x3 = x_ref[pl.ds(yp, K)].reshape(K * Cin, Wp)     # (K*Cin, Wp)
            acc = jnp.zeros((CH, W1), jnp.float32)
            for kx in range(K):
                o = jnp.dot(w1[kx], x3,
                            preferred_element_type=jnp.float32)   # (CH, Wp)
                acc = acc + o[:, kx:kx + W1]
            acc = jnp.maximum(acc + b1, 0.0)
            h1_ref[pl.ds(yp, 1)] = acc[None].astype(h1_ref.dtype)
            return carry

        lax.fori_loop(0, TH + 2, conv1_row, 0)

        # ---- conv2's SAME padding: conv1 outputs that fall outside the image
        # must be exactly 0.  Only a 1-wide ring is affected, so zero it
        # directly instead of masking the whole tensor.
        zcol = jnp.zeros((TH + 2, CH, 1), h1_ref.dtype)
        h1_ref[:, :, 0:1] = zcol                        # left image border
        h1_ref[:, :, W1 - 1:W1] = zcol                  # right image border

        @pl.when(strip_i == 0)
        def _():                                        # top image border
            h1_ref[0:1] = jnp.zeros((1, CH, W1), h1_ref.dtype)

        @pl.when(strip_i == num_strips - 1)
        def _():                                        # bottom image border
            h1_ref[TH + 1:TH + 2] = jnp.zeros((1, CH, W1), h1_ref.dtype)

        # ---- layer 2: 3x3 conv (CH -> CH) + ReLU, fused with
        # ---- layer 3: 1x1 conv (CH -> 1); density row emitted lane-dense.
        def conv2_row(y, carry):
            h3 = h1_ref[pl.ds(y, K)].reshape(K * CH, W1)      # (K*CH, W1)
            acc = jnp.zeros((CH, W), jnp.float32)
            for kx in range(K):
                o = jnp.dot(w2[kx], h3,
                            preferred_element_type=jnp.float32)   # (CH, W1)
                acc = acc + o[:, kx:kx + W]
            acc = jnp.maximum(acc + b2, 0.0)
            dens = jnp.dot(w3, acc.astype(w3.dtype),
                           preferred_element_type=jnp.float32) + b3  # (1, W)
            o_ref[pl.ds(y, 1)] = dens.astype(o_ref.dtype)
            return carry

        lax.fori_loop(0, TH, conv2_row, 0)

    return kernel


def _vmem_bytes_estimate(TH, W, Cin, CH, in_bytes, out_bytes):
    """Rough per-step VMEM footprint (pipeline double-buffers in/out blocks)."""
    lanes = lambda n: -(-n // 128) * 128
    subs = lambda n: -(-n // 8) * 8
    Wp, W1 = W + 2 * HALO, W + 2
    x_blk = 2 * (TH + 2 * HALO) * subs(Cin) * lanes(Wp) * in_bytes
    o_blk = 2 * subs(TH) * lanes(W) * out_bytes
    h1 = (TH + 2) * CH * lanes(W1) * in_bytes
    tmp = (K * CH) * lanes(W1) * in_bytes + 3 * CH * lanes(W1) * 4
    return x_blk + o_blk + h1 + tmp + (2 << 20)


def _pick_strip_rows(H, W, Cin, CH, in_bytes, out_bytes, budget=_PICK_BUDGET):
    """Largest divisor of H whose strip working set fits the VMEM budget."""
    fallback = H
    for th in range(min(H, 512), 0, -1):
        if H % th:
            continue
        fallback = th
        if _vmem_bytes_estimate(th, W, Cin, CH, in_bytes, out_bytes) <= budget:
            return th
    return fallback


@partial(jax.jit, static_argnames=("strip_rows", "compute_dtype"))
def crowd_counter_forward(params, img_nchw, *, strip_rows=None,
                          compute_dtype=jnp.bfloat16):
    """CrowdCounter.forward: density_map = CCN(img).  NCHW in, NCHW out."""
    N, Cin, H, W = img_nchw.shape
    CH = params["w1"].shape[3]
    in_bytes = jnp.dtype(compute_dtype).itemsize
    out_bytes = jnp.dtype(img_nchw.dtype).itemsize
    TH = strip_rows if strip_rows is not None else _pick_strip_rows(
        H, W, Cin, CH, in_bytes, out_bytes)
    assert H % TH == 0, (H, TH)
    num_strips = H // TH
    S = N * num_strips
    Wp, W1 = W + 2 * HALO, W + 2

    # NCHW -> (N, H, Cin, W): spatial width on lanes, channels on sublanes.
    x = jnp.transpose(img_nchw, (0, 2, 1, 3)).astype(compute_dtype)
    xp = jnp.pad(x, ((0, 0), (HALO, HALO), (0, 0), (HALO, HALO)))
    # Pre-cut overlapping (TH+4)-row halo strips so the kernel needs no manual
    # halo DMA; BlockSpec then double-buffers the strip loads automatically.
    strips = [xp[:, i * TH:i * TH + TH + 2 * HALO] for i in range(num_strips)]
    xs = jnp.stack(strips, axis=1).reshape(S, TH + 2 * HALO, Cin, Wp)

    # Weights (ky, kx, ci, co) -> (kx, co, ky*Cin + ci): per-kx deep matmuls
    # contracting over the sublane-stacked (ky, ci) taps.
    w1 = jnp.transpose(params["w1"], (1, 3, 0, 2)).reshape(K, CH, K * Cin)
    w2 = jnp.transpose(params["w2"], (1, 3, 0, 2)).reshape(K, CH, K * CH)
    w3 = params["w3"].reshape(1, CH)
    w1 = w1.astype(compute_dtype)
    w2 = w2.astype(compute_dtype)
    w3 = w3.astype(compute_dtype)
    b1 = params["b1"].reshape(CH, 1).astype(jnp.float32)
    b2 = params["b2"].reshape(CH, 1).astype(jnp.float32)
    b3 = params["b3"].reshape(1, 1).astype(jnp.float32)

    kernel = _make_ccn_kernel(TH, W, Cin, CH, num_strips, compute_dtype)
    dens = pl.pallas_call(
        kernel,
        out_shape=jax.ShapeDtypeStruct((S, TH, W), img_nchw.dtype),
        grid=(S,),
        in_specs=[
            pl.BlockSpec((None, TH + 2 * HALO, Cin, Wp),
                         lambda s: (s, 0, 0, 0)),                 # halo strips
            pl.BlockSpec((K, CH, K * Cin), lambda s: (0, 0, 0)),  # w1 (resident)
            pl.BlockSpec((CH, 1), lambda s: (0, 0)),              # b1
            pl.BlockSpec((K, CH, K * CH), lambda s: (0, 0, 0)),   # w2 (resident)
            pl.BlockSpec((CH, 1), lambda s: (0, 0)),              # b2
            pl.BlockSpec((1, CH), lambda s: (0, 0)),              # w3
            pl.BlockSpec((1, 1), lambda s: (0, 0)),               # b3
        ],
        out_specs=pl.BlockSpec((None, TH, W), lambda s: (s, 0, 0)),
        scratch_shapes=[pltpu.VMEM((TH + 2, CH, W1), compute_dtype)],
        compiler_params=pltpu.CompilerParams(
            dimension_semantics=("parallel",),
            vmem_limit_bytes=_VMEM_LIMIT),
    )(xs, w1, b1, w2, b2, w3, b3)

    return dens.reshape(N, 1, H, W)


def init_params(key, cin=3, hidden=32):
    """Deterministic (Kaiming-normal-like) parameter init for the CCN head."""
    k1, k2, k3 = jax.random.split(key, 3)

    def conv_w(k, kk, ci, co):
        std = (2.0 / (kk * kk * ci)) ** 0.5
        return std * jax.random.normal(k, (kk, kk, ci, co), jnp.float32)

    return {
        "w1": conv_w(k1, 3, cin, hidden),
        "b1": jnp.zeros((hidden,), jnp.float32),
        "w2": conv_w(k2, 3, hidden, hidden),
        "b2": jnp.zeros((hidden,), jnp.float32),
        "w3": conv_w(k3, 1, hidden, 1),
        "b3": jnp.zeros((1,), jnp.float32),
    }


def _reference_forward(params, img_nchw):
    """Pure-JAX reference (lax.conv) for a correctness sanity check."""
    dn = ("NCHW", "HWIO", "NCHW")

    def conv(x, w, b, relu):
        y = jax.lax.conv_general_dilated(x, w, (1, 1), "SAME",
                                         dimension_numbers=dn)
        y = y + b.reshape(1, -1, 1, 1)
        return jnp.maximum(y, 0.0) if relu else y

    x = conv(img_nchw, params["w1"], params["b1"], True)
    x = conv(x, params["w2"], params["b2"], True)
    x = conv(x, params["w3"], params["b3"], False)
    return x


if __name__ == "__main__":
    key = jax.random.PRNGKey(0)
    k_img, k_par = jax.random.split(key)

    N, C, H, W = 2, 3, 16, 16          # small RGB-like image batch
    img = jax.random.normal(k_img, (N, C, H, W), jnp.float32)
    params = init_params(k_par, cin=C, hidden=32)

    ref = _reference_forward(params, img)

    # f32 compute path with 2 strips per image: exact check of the fused,
    # strip-tiled kernel including the cross-strip halo / border-zero logic.
    dens_f32 = jax.block_until_ready(
        crowd_counter_forward(params, img, strip_rows=8,
                              compute_dtype=jnp.float32))
    assert dens_f32.shape == (N, 1, H, W), dens_f32.shape
    assert jnp.allclose(dens_f32, ref, atol=1e-4, rtol=1e-4), (
        float(jnp.max(jnp.abs(dens_f32 - ref))))

    # bf16 MXU path (production setting on v5e/v6e/v7x) with the automatic
    # VMEM-aware strip size: looser tolerance.
    dens_bf16 = jax.block_until_ready(
        crowd_counter_forward(params, img, compute_dtype=jnp.bfloat16))
    assert dens_bf16.shape == (N, 1, H, W), dens_bf16.shape
    assert jnp.allclose(dens_bf16, ref, atol=5e-2, rtol=5e-2), (
        float(jnp.max(jnp.abs(dens_bf16 - ref))))

    print("KERNEL_OK")
</pallas_src>

<mosaic_0001>
module attributes {stable_mosaic.version = 11 : i64} {
  func.func @kernel(%arg0: i32, %arg1: memref<1x12x3x20xf32, #tpu.memory_space<vmem>>, %arg2: memref<3x32x9xf32, #tpu.memory_space<vmem>>, %arg3: memref<32x1xf32, #tpu.memory_space<vmem>>, %arg4: memref<3x32x96xf32, #tpu.memory_space<vmem>>, %arg5: memref<32x1xf32, #tpu.memory_space<vmem>>, %arg6: memref<1x32xf32, #tpu.memory_space<vmem>>, %arg7: memref<1x1xf32, #tpu.memory_space<vmem>>, %arg8: memref<1x8x16xf32, #tpu.memory_space<vmem>>, %arg9: memref<10x32x18xf32, #tpu.memory_space<vmem>>) attributes {dimension_semantics = [#tpu.dimension_semantics<parallel>], iteration_bounds = array<i64: 4>, scalar_prefetch = 0 : i64, scratch_operands = 1 : i64, tpu.core_type = #tpu.core_type<tc>, window_params = [{transform_indices = @transform_0, window_bounds = array<i64: 1, 12, 3, 20>}, {pipeline_mode = #tpu.pipeline_mode<synchronous>, transform_indices = @transform_1, window_bounds = array<i64: 3, 32, 9>}, {pipeline_mode = #tpu.pipeline_mode<synchronous>, transform_indices = @transform_2, window_bounds = array<i64: 32, 1>}, {pipeline_mode = #tpu.pipeline_mode<synchronous>, transform_indices = @transform_3, window_bounds = array<i64: 3, 32, 96>}, {pipeline_mode = #tpu.pipeline_mode<synchronous>, transform_indices = @transform_4, window_bounds = array<i64: 32, 1>}, {pipeline_mode = #tpu.pipeline_mode<synchronous>, transform_indices = @transform_5, window_bounds = array<i64: 1, 32>}, {pipeline_mode = #tpu.pipeline_mode<synchronous>, transform_indices = @transform_6, window_bounds = array<i64: 1, 1>}, {transform_indices = @transform_7, window_bounds = array<i64: 1, 8, 16>}]} {
    %c2_i32 = arith.constant 2 : i32
    %c0_i32 = arith.constant 0 : i32
    %0 = arith.cmpi eq, %c2_i32, %c0_i32 : i32
    %c1_i32 = arith.constant 1 : i32
    %1 = arith.select %0, %c1_i32, %c2_i32 : i32
    %2 = arith.remsi %arg0, %1 : i32
    %c0_i32_0 = arith.constant 0 : i32
    %3 = arith.cmpi ne, %2, %c0_i32_0 : i32
    %c0_i32_1 = arith.constant 0 : i32
    %4 = arith.cmpi slt, %2, %c0_i32_1 : i32
    %c0_i32_2 = arith.constant 0 : i32
    %5 = arith.cmpi slt, %1, %c0_i32_2 : i32
    %6 = arith.xori %4, %5 : i1
    %7 = arith.andi %6, %3 : i1
    %8 = arith.addi %2, %1 : i32
    %9 = arith.select %7, %8, %2 : i32
    %c0 = arith.constant 0 : index
    %c0_3 = arith.constant 0 : index
    %c0_4 = arith.constant 0 : index
    %10 = vector.load %arg2[%c0, %c0_3, %c0_4] : memref<3x32x9xf32, #tpu.memory_space<vmem>>, vector<3x32x9xf32>
    %c0_5 = arith.constant 0 : index
    %c0_6 = arith.constant 0 : index
    %11 = vector.load %arg3[%c0_5, %c0_6] : memref<32x1xf32, #tpu.memory_space<vmem>>, vector<32x1xf32>
    %c0_7 = arith.constant 0 : index
    %c0_8 = arith.constant 0 : index
    %c0_9 = arith.constant 0 : index
    %12 = vector.load %arg4[%c0_7, %c0_8, %c0_9] : memref<3x32x96xf32, #tpu.memory_space<vmem>>, vector<3x32x96xf32>
    %c0_10 = arith.constant 0 : index
    %c0_11 = arith.constant 0 : index
    %13 = vector.load %arg5[%c0_10, %c0_11] : memref<32x1xf32, #tpu.memory_space<vmem>>, vector<32x1xf32>
    %c0_12 = arith.constant 0 : index
    %c0_13 = arith.constant 0 : index
    %14 = vector.load %arg6[%c0_12, %c0_13] : memref<1x32xf32, #tpu.memory_space<vmem>>, vector<1x32xf32>
    %c0_14 = arith.constant 0 : index
    %c0_15 = arith.constant 0 : index
    %15 = vector.load %arg7[%c0_14, %c0_15] : memref<1x1xf32, #tpu.memory_space<vmem>>, vector<1x1xf32>
    %c0_i32_16 = arith.constant 0 : i32
    %c10_i32 = arith.constant 10 : i32
    %16 = arith.addi %c0_i32_16, %c10_i32 : i32
    %c1_i32_17 = arith.constant 1 : i32
    scf.for %arg10 = %c0_i32_16 to %16 step %c1_i32_17  : i32 {
      %c0_31 = arith.constant 0 : index
      %27 = arith.index_cast %arg10 : i32 to index
      %c0_32 = arith.constant 0 : index
      %c0_33 = arith.constant 0 : index
      %28 = vector.load %arg1[%c0_31, %27, %c0_32, %c0_33] : memref<1x12x3x20xf32, #tpu.memory_space<vmem>>, vector<1x3x3x20xf32>
      %29 = vector.shape_cast %28 : vector<1x3x3x20xf32> to vector<3x3x20xf32>
      %30 = vector.shape_cast %29 : vector<3x3x20xf32> to vector<9x20xf32>
      %cst_34 = arith.constant 0.000000e+00 : f32
      %31 = vector.broadcast %cst_34 : f32 to vector<32x18xf32>
      %32 = vector.extract_strided_slice %10 {offsets = [0, 0, 0], sizes = [1, 32, 9], strides = [1, 1, 1]} : vector<3x32x9xf32> to vector<1x32x9xf32>
      %33 = vector.shape_cast %32 : vector<1x32x9xf32> to vector<32x9xf32>
      %cst_35 = arith.constant dense<0.000000e+00> : vector<32x20xf32>
      %34 = tpu.matmul %33, %30, %cst_35 {dimension_numbers = #tpu.dot_dimension_numbers<[1], [0], [0], [1], [0, 0, 1, 1], [], []>} : vector<32x9xf32>, vector<9x20xf32>, vector<32x20xf32> -> vector<32x20xf32>
      %35 = vector.extract_strided_slice %34 {offsets = [0, 0], sizes = [32, 18], strides = [1, 1]} : vector<32x20xf32> to vector<32x18xf32>
      %36 = arith.addf %31, %35 : vector<32x18xf32>
      %37 = vector.extract_strided_slice %10 {offsets = [1, 0, 0], sizes = [1, 32, 9], strides = [1, 1, 1]} : vector<3x32x9xf32> to vector<1x32x9xf32>
      %38 = vector.shape_cast %37 : vector<1x32x9xf32> to vector<32x9xf32>
      %cst_36 = arith.constant dense<0.000000e+00> : vector<32x20xf32>
      %39 = tpu.matmul %38, %30, %cst_36 {dimension_numbers = #tpu.dot_dimension_numbers<[1], [0], [0], [1], [0, 0, 1, 1], [], []>} : vector<32x9xf32>, vector<9x20xf32>, vector<32x20xf32> -> vector<32x20xf32>
      %40 = vector.extract_strided_slice %39 {offsets = [0, 1], sizes = [32, 18], strides = [1, 1]} : vector<32x20xf32> to vector<32x18xf32>
      %41 = arith.addf %36, %40 : vector<32x18xf32>
      %42 = vector.extract_strided_slice %10 {offsets = [2, 0, 0], sizes = [1, 32, 9], strides = [1, 1, 1]} : vector<3x32x9xf32> to vector<1x32x9xf32>
      %43 = vector.shape_cast %42 : vector<1x32x9xf32> to vector<32x9xf32>
      %cst_37 = arith.constant dense<0.000000e+00> : vector<32x20xf32>
      %44 = tpu.matmul %43, %30, %cst_37 {dimension_numbers = #tpu.dot_dimension_numbers<[1], [0], [0], [1], [0, 0, 1, 1], [], []>} : vector<32x9xf32>, vector<9x20xf32>, vector<32x20xf32> -> vector<32x20xf32>
      %45 = vector.extract_strided_slice %44 {offsets = [0, 2], sizes = [32, 18], strides = [1, 1]} : vector<32x20xf32> to vector<32x18xf32>
      %46 = arith.addf %41, %45 : vector<32x18xf32>
      %47 = vector.broadcast %11 : vector<32x1xf32> to vector<32x18xf32>
      %48 = arith.addf %46, %47 : vector<32x18xf32>
      %cst_38 = arith.constant 0.000000e+00 : f32
      %49 = vector.broadcast %cst_38 : f32 to vector<32x18xf32>
      %50 = arith.maximumf %48, %49 : vector<32x18xf32>
      %51 = vector.shape_cast %50 : vector<32x18xf32> to vector<1x32x18xf32>
      %52 = arith.index_cast %arg10 : i32 to index
      %c0_39 = arith.constant 0 : index
      %c0_40 = arith.constant 0 : index
      %53 = vector.load %arg9[%52, %c0_39, %c0_40] : memref<10x32x18xf32, #tpu.memory_space<vmem>>, vector<1x32x18xf32>
      tpu.vector_store %arg9[%52, %c0_39, %c0_40], %51 {strides = array<i32>} : memref<10x32x18xf32, #tpu.memory_space<vmem>>, vector<1x32x18xf32>,
    }
    %c10_i32_18 = arith.constant 10 : i32
    %cst = arith.constant 0.000000e+00 : f32
    %17 = vector.broadcast %cst : f32 to vector<10x32x1xf32>
    %c0_19 = arith.constant 0 : index
    %c0_20 = arith.constant 0 : index
    %c0_21 = arith.constant 0 : index
    %18 = vector.load %arg9[%c0_19, %c0_20, %c0_21] : memref<10x32x18xf32, #tpu.memory_space<vmem>>, vector<10x32x1xf32>
    tpu.vector_store %arg9[%c0_19, %c0_20, %c0_21], %17 {strides = array<i32>} : memref<10x32x18xf32, #tpu.memory_space<vmem>>, vector<10x32x1xf32>,
    %c0_22 = arith.constant 0 : index
    %c0_23 = arith.constant 0 : index
    %c17 = arith.constant 17 : index
    %19 = vector.load %arg9[%c0_22, %c0_23, %c17] : memref<10x32x18xf32, #tpu.memory_space<vmem>>, vector<10x32x1xf32>
    tpu.vector_store %arg9[%c0_22, %c0_23, %c17], %17 {strides = array<i32>} : memref<10x32x18xf32, #tpu.memory_space<vmem>>, vector<10x32x1xf32>,
    %c0_i32_24 = arith.constant 0 : i32
    %20 = arith.cmpi eq, %9, %c0_i32_24 : i32
    %21 = arith.extui %20 : i1 to i32
    %c0_i32_25 = arith.constant 0 : i32
    %22 = arith.cmpi ne, %21, %c0_i32_25 : i32
    scf.if %22 {
      %cst_31 = arith.constant 0.000000e+00 : f32
      %27 = vector.broadcast %cst_31 : f32 to vector<1x32x18xf32>
      %c0_32 = arith.constant 0 : index
      %c0_33 = arith.constant 0 : index
      %c0_34 = arith.constant 0 : index
      %28 = vector.load %arg9[%c0_32, %c0_33, %c0_34] : memref<10x32x18xf32, #tpu.memory_space<vmem>>, vector<1x32x18xf32>
      tpu.vector_store %arg9[%c0_32, %c0_33, %c0_34], %27 {strides = array<i32>} : memref<10x32x18xf32, #tpu.memory_space<vmem>>, vector<1x32x18xf32>,
    } else {
    }
    %c1_i32_26 = arith.constant 1 : i32
    %23 = arith.cmpi eq, %9, %c1_i32_26 : i32
    %24 = arith.extui %23 : i1 to i32
    %c0_i32_27 = arith.constant 0 : i32
    %25 = arith.cmpi ne, %24, %c0_i32_27 : i32
    scf.if %25 {
      %cst_31 = arith.constant 0.000000e+00 : f32
      %27 = vector.broadcast %cst_31 : f32 to vector<1x32x18xf32>
      %c9 = arith.constant 9 : index
      %c0_32 = arith.constant 0 : index
      %c0_33 = arith.constant 0 : index
      %28 = vector.load %arg9[%c9, %c0_32, %c0_33] : memref<10x32x18xf32, #tpu.memory_space<vmem>>, vector<1x32x18xf32>
      tpu.vector_store %arg9[%c9, %c0_32, %c0_33], %27 {strides = array<i32>} : memref<10x32x18xf32, #tpu.memory_space<vmem>>, vector<1x32x18xf32>,
    } else {
    }
    %c0_i32_28 = arith.constant 0 : i32
    %c8_i32 = arith.constant 8 : i32
    %26 = arith.addi %c0_i32_28, %c8_i32 : i32
    %c1_i32_29 = arith.constant 1 : i32
    scf.for %arg10 = %c0_i32_28 to %26 step %c1_i32_29  : i32 {
      %27 = arith.index_cast %arg10 : i32 to index
      %c0_31 = arith.constant 0 : index
      %c0_32 = arith.constant 0 : index
      %28 = vector.load %arg9[%27, %c0_31, %c0_32] : memref<10x32x18xf32, #tpu.memory_space<vmem>>, vector<3x32x18xf32>
      %29 = vector.shape_cast %28 : vector<3x32x18xf32> to vector<96x18xf32>
      %cst_33 = arith.constant 0.000000e+00 : f32
      %30 = vector.broadcast %cst_33 : f32 to vector<32x16xf32>
      %31 = vector.extract_strided_slice %12 {offsets = [0, 0, 0], sizes = [1, 32, 96], strides = [1, 1, 1]} : vector<3x32x96xf32> to vector<1x32x96xf32>
      %32 = vector.shape_cast %31 : vector<1x32x96xf32> to vector<32x96xf32>
      %cst_34 = arith.constant dense<0.000000e+00> : vector<32x18xf32>
      %33 = tpu.matmul %32, %29, %cst_34 {dimension_numbers = #tpu.dot_dimension_numbers<[1], [0], [0], [1], [0, 0, 1, 1], [], []>} : vector<32x96xf32>, vector<96x18xf32>, vector<32x18xf32> -> vector<32x18xf32>
      %34 = vector.extract_strided_slice %33 {offsets = [0, 0], sizes = [32, 16], strides = [1, 1]} : vector<32x18xf32> to vector<32x16xf32>
      %35 = arith.addf %30, %34 : vector<32x16xf32>
      %36 = vector.extract_strided_slice %12 {offsets = [1, 0, 0], sizes = [1, 32, 96], strides = [1, 1, 1]} : vector<3x32x96xf32> to vector<1x32x96xf32>
      %37 = vector.shape_cast %36 : vector<1x32x96xf32> to vector<32x96xf32>
      %cst_35 = arith.constant dense<0.000000e+00> : vector<32x18xf32>
      %38 = tpu.matmul %37, %29, %cst_35 {dimension_numbers = #tpu.dot_dimension_numbers<[1], [0], [0], [1], [0, 0, 1, 1], [], []>} : vector<32x96xf32>, vector<96x18xf32>, vector<32x18xf32> -> vector<32x18xf32>
      %39 = vector.extract_strided_slice %38 {offsets = [0, 1], sizes = [32, 16], strides = [1, 1]} : vector<32x18xf32> to vector<32x16xf32>
      %40 = arith.addf %35, %39 : vector<32x16xf32>
      %41 = vector.extract_strided_slice %12 {offsets = [2, 0, 0], sizes = [1, 32, 96], strides = [1, 1, 1]} : vector<3x32x96xf32> to vector<1x32x96xf32>
      %42 = vector.shape_cast %41 : vector<1x32x96xf32> to vector<32x96xf32>
      %cst_36 = arith.constant dense<0.000000e+00> : vector<32x18xf32>
      %43 = tpu.matmul %42, %29, %cst_36 {dimension_numbers = #tpu.dot_dimension_numbers<[1], [0], [0], [1], [0, 0, 1, 1], [], []>} : vector<32x96xf32>, vector<96x18xf32>, vector<32x18xf32> -> vector<32x18xf32>
      %44 = vector.extract_strided_slice %43 {offsets = [0, 2], sizes = [32, 16], strides = [1, 1]} : vector<32x18xf32> to vector<32x16xf32>
      %45 = arith.addf %40, %44 : vector<32x16xf32>
      %46 = vector.broadcast %13 : vector<32x1xf32> to vector<32x16xf32>
      %47 = arith.addf %45, %46 : vector<32x16xf32>
      %cst_37 = arith.constant 0.000000e+00 : f32
      %48 = vector.broadcast %cst_37 : f32 to vector<32x16xf32>
      %49 = arith.maximumf %47, %48 : vector<32x16xf32>
      %cst_38 = arith.constant dense<0.000000e+00> : vector<1x16xf32>
      %50 = tpu.matmul %14, %49, %cst_38 {dimension_numbers = #tpu.dot_dimension_numbers<[1], [0], [0], [1], [0, 0, 1, 1], [], []>} : vector<1x32xf32>, vector<32x16xf32>, vector<1x16xf32> -> vector<1x16xf32>
      %51 = vector.broadcast %15 : vector<1x1xf32> to vector<1x16xf32>
      %52 = arith.addf %50, %51 : vector<1x16xf32>
      %c0_39 = arith.constant 0 : index
      %53 = arith.index_cast %arg10 : i32 to index
      %c0_40 = arith.constant 0 : index
      %54 = vector.load %arg8[%c0_39, %53, %c0_40] : memref<1x8x16xf32, #tpu.memory_space<vmem>>, vector<1x1x16xf32>
      %55 = vector.shape_cast %54 : vector<1x1x16xf32> to vector<1x16xf32>
      %56 = vector.shape_cast %52 : vector<1x16xf32> to vector<1x1x16xf32>
      tpu.vector_store %arg8[%c0_39, %53, %c0_40], %56 {strides = array<i32>} : memref<1x8x16xf32, #tpu.memory_space<vmem>>, vector<1x1x16xf32>,
    }
    %c8_i32_30 = arith.constant 8 : i32
    return
  }
  func.func @transform_0(%arg0: i32) -> (i32, i32, i32, i32) {
    %c0_i32 = arith.constant 0 : i32
    %c0_i32_0 = arith.constant 0 : i32
    %c0_i32_1 = arith.constant 0 : i32
    %c0_i32_2 = arith.constant 0 : i32
    return %arg0, %c0_i32, %c0_i32_0, %c0_i32_1 : i32, i32, i32, i32
  }
  func.func @transform_1(%arg0: i32) -> (i32, i32, i32) {
    %c0_i32 = arith.constant 0 : i32
    %c0_i32_0 = arith.constant 0 : i32
    %c0_i32_1 = arith.constant 0 : i32
    %c0_i32_2 = arith.constant 0 : i32
    return %c0_i32, %c0_i32_0, %c0_i32_1 : i32, i32, i32
  }
  func.func @transform_2(%arg0: i32) -> (i32, i32) {
    %c0_i32 = arith.constant 0 : i32
    %c0_i32_0 = arith.constant 0 : i32
    %c0_i32_1 = arith.constant 0 : i32
    return %c0_i32, %c0_i32_0 : i32, i32
  }
  func.func @transform_3(%arg0: i32) -> (i32, i32, i32) {
    %c0_i32 = arith.constant 0 : i32
    %c0_i32_0 = arith.constant 0 : i32
    %c0_i32_1 = arith.constant 0 : i32
    %c0_i32_2 = arith.constant 0 : i32
    return %c0_i32, %c0_i32_0, %c0_i32_1 : i32, i32, i32
  }
  func.func @transform_4(%arg0: i32) -> (i32, i32) {
    %c0_i32 = arith.constant 0 : i32
    %c0_i32_0 = arith.constant 0 : i32
    %c0_i32_1 = arith.constant 0 : i32
    return %c0_i32, %c0_i32_0 : i32, i32
  }
  func.func @transform_5(%arg0: i32) -> (i32, i32) {
    %c0_i32 = arith.constant 0 : i32
    %c0_i32_0 = arith.constant 0 : i32
    %c0_i32_1 = arith.constant 0 : i32
    return %c0_i32, %c0_i32_0 : i32, i32
  }
  func.func @transform_6(%arg0: i32) -> (i32, i32) {
    %c0_i32 = arith.constant 0 : i32
    %c0_i32_0 = arith.constant 0 : i32
    %c0_i32_1 = arith.constant 0 : i32
    return %c0_i32, %c0_i32_0 : i32, i32
  }
  func.func @transform_7(%arg0: i32) -> (i32, i32, i32) {
    %c0_i32 = arith.constant 0 : i32
    %c0_i32_0 = arith.constant 0 : i32
    %c0_i32_1 = arith.constant 0 : i32
    return %arg0, %c0_i32, %c0_i32_0 : i32, i32, i32
  }
}

</mosaic_0001>

<bundles_post_ra>
// kernel: crowd_counter_forward.1
= control target key start
LH: loop header
LB: loop body
LE: loop exit
PB: predicated region body
PF: predicated region fallthrough
CT: control target
= control target key end

     0   :  { %s2553_s0 = inlined_call_operand.vmem [shape: f32[4,12,3,20], index: 0, kind: input, shape index: {}]   ;;  %s2554_s1 = inlined_call_operand.vmem [shape: f32[3,32,9], index: 1, kind: input, shape index: {}]   ;;  %s2555_s2 = inlined_call_operand.vmem [shape: f32[32,1], index: 2, kind: input, shape index: {}]   ;;  %s2556_s3 = inlined_call_operand.vmem [shape: f32[3,32,96], index: 3, kind: input, shape index: {}]   ;;  %s2557_s4 = inlined_call_operand.vmem [shape: f32[32,1], index: 4, kind: input, shape index: {}]   ;;  %s2558_s5 = inlined_call_operand.vmem [shape: f32[1,32], index: 5, kind: input, shape index: {}]   ;;  %s2559_s6 = inlined_call_operand.<no memory space> [shape: f32[1,1], index: 6, kind: input, shape index: {}]   ;;  %s2560_s7 = inlined_call_operand.hbm [shape: f32[4,8,16], index: 7, kind: output, shape index: {}]  }
   0x1   :  { %v12_v0 = vstv %s2559_s6 }
   0x2   :  { %13 = vst [vmem:[#allocation3] sm:$0x1] %v12_v0 }
   0x3   :  { %14 = vsyncpa [#allocation5], 0 }
   0x4   :  { %16 = vsyncpa [#allocation5 + $0x1], 0  ;;  %s1968_s26 = smov 0   ;;  %s1970_s27 = smov 0  }
   0x5   :  { %s1972_s28 = smov 0   ;;  %s1974_s29 = smov 0  }
   0x6 LB: > { %s1989_s6 = sadd.s32 4294967295, %s1902_s29   ;;  %s1507_s30 = sadd.s32 4294967294, %s1902_s29   ;;  %s1902_s29 = sphi %s1974_s29, %s2568_s29   ;;  %s1898_s28 = sphi %s1972_s28, %s2567_s28   ;;  %s1894_s27 = sphi %s1970_s27, %s2566_s27   ;;  %s1890_s26 = sphi %s1968_s26, %s2565_s26  }
   0x7   : > { %s1993_s8 = sadd.s32 1, %s1902_s29   ;;  %s181_s9 = sadd.s32 1, %s1898_s28 }
   0x8   : > { %s178_s10 = ssub.s32 %s1902_s29, %s1993_s8  ;;  %p191_p0 = scmp.ne.s32.totalorder %s1898_s28, %s1894_s27 }
   0x9   : > { %p179_p1 = scmp.eq.s32.totalorder %s178_s10, 0  ;;  %p192_p2 = scmp.eq.s32.totalorder %s1989_s6, 3 }
   0xa   : > { %p197_p3 = scmp.ne.s32.totalorder %s1894_s27, %s1890_s26  ;;  %p198_p4 = scmp.eq.s32.totalorder %s1507_s30, 3 }
   0xb   : > { %s2004_s11 = scalar_select %p179_p1, %s1898_s28, %s181_s9  }
   0xc   : > { %p2006_p5 = por %p192_p2, %p191_p0  ;;  %p2010_p6 = por %p198_p4, %p197_p3 }
   0xd   : > { %p1510_p7 = scmp.ge.s32.totalorder %s1902_s29, 1  ;;  %p242_p8 = scmp.lt.s32.totalorder %s1902_s29, 5 }
   0xf   : > { %p243_p9 = pnand %p1510_p7, %p242_p8 }
  0x10   : > { %s2561_s14 = sand.u32 (!%p243_p9), 1, %s1894_s27   ;;  %p274_p10 = scmp.lt.s32.totalorder (!%p243_p9), %s1989_s6, 3 }
  0x11   : > { %246 = sbr.rel (%p243_p9) target bundleno = 1032 (0x408), region = 48  ;;  %s2035_s21 = sshll.u32 (!%p243_p9), %s2561_s14, 3 }
  0x12   : > { %s280_s10 = ssub.s32 (!%p243_p9), 0, %s1989_s6  ;;  %p279_p11 = scmp.lt.s32.totalorder (!%p243_p9), %s1989_s6, 0 }
  0x13   : > { %s1513_s16 = smin.u32 (!%p243_p9), %s1989_s6, %s280_s10  ;;  %s273_s23 = scalar_lea.vmem (!%p243_p9), [#allocation4], %s2035_s21 }
  0x14   : > { %s282_s30 = sand.u32 (!%p243_p9), 1, %s1513_s16  }
  0x15   : > { %s283_s20 = ssub.s32 (!%p243_p9), 0, %s282_s30 }
  0x16   : > { %v2021_v1 = vld [vmem:[%s2554_s1] sm:$0xff]  ;;  %v2026_v2 = vld [vmem:[%s2554_s1 + $0x8] sm:$0xff]  ;;  %v2031_v3 = vld [vmem:[%s2554_s1 + $0x10] sm:$0xff]  ;;  %s275_s22 = scalar_select %p274_p10, %s1989_s6, 3 }
  0x17   : > { %v2040_v4 = vld [vmem:[%s2554_s1 + $0x18] sm:$0xff]  ;;  %v2045_v5 = vld [vmem:[%s2554_s1 + $0x20] sm:$0xff]  ;;  %v2050_v6 = vld [vmem:[%s2554_s1 + $0x28] sm:$0xff]  ;;  %s2570_s20 = smov (!%p279_p11, %s283_s20), %s282_s30  ;;  %s2203_s30 = smov 0  }
  0x18   : > { %v2056_v7 = vld [vmem:[%s2554_s1 + $0x30] sm:$0xff]  ;;  %v2061_v8 = vld [vmem:[%s2554_s1 + $0x38] sm:$0xff]  ;;  %v2066_v9 = vld [vmem:[%s2554_s1 + $0x40] sm:$0xff]  ;;  %s1762_s25 = smul.u32 48, %s275_s22  ;;  %p1515_p12 = scmp.lt.s32.totalorder %s2570_s20, 0 }
  0x19   : > { %v2072_v10 = vld [vmem:[%s2554_s1 + $0x48] sm:$0xff]  ;;  %v2077_v11 = vld [vmem:[%s2554_s1 + $0x50] sm:$0xff]  ;;  %v2082_v12 = vld [vmem:[%s2554_s1 + $0x58] sm:$0xff] }
  0x1a   : > { %v2089_v13 = vld [vmem:[%s2555_s2] sm:$0xff]  ;;  %v2094_v14 = vld [vmem:[%s2555_s2 + $0x8] sm:$0xff]  ;;  %v2099_v15 = vld [vmem:[%s2555_s2 + $0x10] sm:$0xff]  ;;  %s2134_s18 = scalar_lea.vmem %s2553_s0, %s1762_s25  ;;  %s289_s25 = sadd.s32 2, %s2570_s20 }
  0x1b   : > { %v2104_v16 = vld [vmem:[%s2555_s2 + $0x18] sm:$0xff]  ;;  %v2109_v17 = vld [vmem:[%s2556_s3] sm:$0xff]  ;;  %v2114_v18 = vld [vmem:[%s2556_s3 + $0x8] sm:$0xff]  ;;  %s2572_s25 = smov (!%p1515_p12, %s289_s25), %s2570_s20 }
  0x1c   : > { %v2119_v19 = vld [vmem:[%s2556_s3 + $0x10] sm:$0xff]  ;;  %v2124_v20 = vld [vmem:[%s2556_s3 + $0x18] sm:$0xff]  ;;  %v2129_v21 = vld [vmem:[%s2556_s3 + $0x20] sm:$0xff] }
  0x1d   : > { %v2139_v22 = vld [vmem:[%s2556_s3 + $0x28] sm:$0xff]  ;;  %v2144_v23 = vld [vmem:[%s2556_s3 + $0x30] sm:$0xff]  ;;  %v2149_v24 = vld [vmem:[%s2556_s3 + $0x38] sm:$0xff] }
  0x1e   : > { %v2156_v25 = vld [vmem:[%s2556_s3 + $0x40] sm:$0xff]  ;;  %v2161_v26 = vld [vmem:[%s2556_s3 + $0x48] sm:$0xff]  ;;  %v2166_v27 = vld [vmem:[%s2556_s3 + $0x50] sm:$0xff] }
  0x1f   : > { %v2171_v28 = vld [vmem:[%s2556_s3 + $0x58] sm:$0xff]  ;;  %v2176_v29 = vld [vmem:[%s2557_s4] sm:$0xff]  ;;  %v2181_v30 = vld [vmem:[%s2557_s4 + $0x8] sm:$0xff] }
  0x20   : > { %v2186_v31 = vld [vmem:[%s2557_s4 + $0x10] sm:$0xff]  ;;  %v2191_v32 = vld [vmem:[%s2557_s4 + $0x18] sm:$0xff]  ;;  %v2196_v33 = vld [vmem:[%s2558_s5] sm:$0x1] }
  0x21   : > { %v2198_v34 = vld [vmem:[#allocation3] sm:$0x1] }
  0x22 LB: >> { %v350_v35 = vlaneseq  ;;  %vm472_vm0 = vcmask 72704   ;;  %v1912_v36 = vmov 1966171168   ;;  %s1516_s20 = sshll.u32 %s1906_s30, 2  ;;  %v1913_v39 = vmov 0   ;;  %s1914_s22 = smov 127   ;;  %s1906_s30 = sphi %s2203_s30, %s330_s30  }
  0x23   : >> { %v348_v37 = vunpack.c.l.s4 %v1912_v36  ;;  %1634 = vmatprep.mubr.msk.f32.mxu1 %vm472_vm0, %v2031_v3  ;;  %1631 = vmatprep.mubr.msk.f32.mxu0 %vm472_vm0, %v2021_v1  ;;  %s332_s24 = scalar_lea.vmem %s2134_s18, %s1516_s20  ;;  %vm485_vm1 = vcmask 1040384   ;;  %s1915_s16 = smov 126   ;;  %vm841_vm2 = vcmask 146432  }
  0x24   : >> { %v2213_v38 = vshrl.u32 %v350_v35, 7  ;;  %1831 = vset.pattern.permute.xlu1 %v1913_v39  ;;  %1830 = vset.pattern.permute.xlu0 %v1913_v39  ;;  %v1519_v41 = vld.sshfl [vmem:[%s332_s24 + $0x8] sm:$0x13 pattern:$0x75316420]  ;;  %s1535_s9 = sshll.u32 %s1906_s30, 5 }
  0x25   : >> { %v349_v40 = vunpack.c.0.s8 %v348_v37  ;;  %823 = vperm.xlu1 %1831, %v2099_v15   ;;  %813 = vperm.xlu0 %1830, %v2089_v13   ;;  %v392_v43 = vcombine.high %v1519_v41, %v1519_v41  ;;  %v1517_v44 = vld.sshfl [vmem:[%s332_s24] sm:$0x13 pattern:$0x75316420]  ;;  %s840_s14 = scalar_lea.vmem [#allocation2], %s1535_s9  ;;  %s330_s30 = sadd.s32 1, %s1906_s30  }
  0x26   : >> { %v1518_v45 = vld.sshfl [vmem:[%s332_s24 + $0x4] sm:$0x13 pattern:$0x75316420]  ;;  %v346_v46 = vcombine.high %v1517_v44, %v1517_v44  ;;  %p327_p13 = scmp.ge.s32.totalorder %s330_s30, 10  }
  0x27   : >> { %v352_v42 = vsub.s32 %v349_v40, %v2213_v38  ;;  %v369_v49 = vcombine.high %v1518_v45, %v1518_v45  ;;  %vm846_vm3 = vcmask (%p327_p13), 7168   ;;  %vm887_vm4 = vcmask (%p327_p13), 146568   ;;  %p1536_p0 = scmp.ne.s32.totalorder (%p327_p13), %s2572_s25, 0 }
  0x29   : >> { %v399_v47 = vrot.slane %v1519_v41, %v352_v42  ;;  %v353_v48 = vrot.slane %v1517_v44, %v352_v42  ;;  %v376_v50 = vrot.slane %v1518_v45, %v352_v42  ;;  %828 = vperm.xlu1 %1831, %v2104_v16   ;;  %v360_v51 = vrot.slane %v346_v46, %v352_v42 }
  0x2a   : >> { %v406_v52 = vrot.slane %v392_v43, %v352_v42  ;;  %818 = vperm.xlu0 %1830, %v2094_v14   ;;  %v383_v55 = vrot.slane %v369_v49, %v352_v42 }
  0x2b   : >> { %v407_v53 = vcombine.high %v399_v47, %v399_v47  ;;  %v361_v54 = vcombine.high %v353_v48, %v353_v48  ;;  %v384_v56 = vcombine.high %v376_v50, %v376_v50  ;;  %v408_v57 = vcombine.low %v353_v48, %v360_v51 }
  0x2c   : >> { %v411_v58 = vcombine.low %v399_v47, %v406_v52 }
  0x2d   : >> { %v463_v59 = vrot.slane %v407_v53, %v352_v42  ;;  %v409_v60 = vcombine.low %v361_v54, %v376_v50  ;;  %v410_v61 = vcombine.low %v383_v55, %v384_v56  ;;  %v418_v62 = vrot.slane %v408_v57, %v352_v42 }
  0x2e   : >> { %v439_v63 = vrot.slane %v411_v58, %v352_v42 }
  0x2f   : >> { %v470_v0 = vrot.slane %v463_v59, %v352_v42  ;;  %v425_v35 = vrot.slane %v409_v60, %v352_v42  ;;  %v432_v36 = vrot.slane %v410_v61, %v352_v42 }
  0x31   : >> { %1758 = vmatprep.subr.msk.mxu1 %vm485_vm1, %v470_v0  ;;  %v440_v37 = vcombine.low %v418_v62, %v425_v35  ;;  %v441_v39 = vcombine.low %v432_v36, %v439_v63  ;;  %1627 = vmatprep.subr.msk.mxu0 %vm485_vm1, %v470_v0 }
  0x32   : >> { %1760 = vmatpush3.msk.msra.mxu1 %vm485_vm1, %v470_v0  ;;  %1628 = vmatpush3.msk.msra.mxu0 %vm485_vm1, %v470_v0 }
  0x33   : >> { %v448_v40 = vrot.slane %v440_v37, %v352_v42  ;;  %v455_v41 = vrot.slane %v441_v39, %v352_v42 }
  0x35   : >> { %v456_v43 = vcombine.low %v448_v40, %v455_v41 }
  0x37   : >> { %1759 = vmatprep.subr.mxu1 %v456_v43  ;;  %1629 = vmatprep.subr.mxu0 %v456_v43 }
  0x38   : >> { %1761 = vmatpush3.msra.mxu1 %v456_v43  ;;  %1630 = vmatpush3.msra.mxu0 %v456_v43 }
  0x39   : >> { %1635 = vmatmul.mubr.msk.f32.vlgmr.msra.gmra.mxu1 %vm472_vm0, %v2040_v4  ;;  %1637 = vmatprep.subr.msk.mxu1 %vm485_vm1, %v470_v0 }
  0x3a   : >> { %1638 = vmatpush3.msk.msra.mxu1 %vm485_vm1, %v470_v0  ;;  %1632 = vmatmul.mubr.msk.f32.vlgmr.msra.gmra.mxu0 %vm472_vm0, %v2026_v2 }
  0x3b   : >> { %1639 = vmatprep.subr.mxu1 %v456_v43  ;;  %1641 = vmatprep.mubr.msk.f32.mxu1 %vm472_vm0, %v2045_v5 }
  0x3c   : >> { %1640 = vmatpush3.msra.mxu1 %v456_v43  ;;  %1647 = vmatprep.subr.msk.mxu0 %vm485_vm1, %v470_v0 }
  0x3d   : >> { %1642 = vmatmul.mubr.msk.f32.vlgmr.msra.gmra.mxu1 %vm472_vm0, %v2050_v6  ;;  %1648 = vmatpush3.msk.msra.mxu0 %vm485_vm1, %v470_v0 }
  0x3e   : >> { %1649 = vmatprep.subr.mxu0 %v456_v43  ;;  %1651 = vmatprep.mubr.msk.f32.mxu0 %vm472_vm0, %v2066_v9 }
  0x3f   : >> { %1650 = vmatpush3.msra.mxu0 %v456_v43  ;;  %1644 = vmatprep.mubr.msk.f32.mxu1 %vm472_vm0, %v2056_v7 }
  0x40   : >> { %1652 = vmatmul.mubr.msk.f32.vlgmr.msra.gmra.mxu0 %vm472_vm0, %v2072_v10 }
  0x41   : >> { %1645 = vmatmul.mubr.msk.f32.gmra.mxu1 %vm472_vm0, %v2061_v8  ;;  %1654 = vmatprep.mubr.msk.f32.mxu0 %vm472_vm0, %v2077_v11 }
  0x44   : >> { %1655 = vmatmul.mubr.msk.f32.gmra.mxu0 %vm472_vm0, %v2082_v12 }
  0xa0   : >> { %v824_v55 = vpop.permute.xlu1 %823  ;;  %v814_v56 = vpop.permute.xlu0 %813 }
  0xa4   : >> { %v829_v57 = vpop.permute.xlu1 %828 }
  0xa5   : >> { %v819_v58 = vpop.permute.xlu0 %818 }
  0xf9   : >> { %v1636_v42 = vpop.f32.mrf.mxu1 }
  0xfa   : >> { %v1633_v44 = vpop.f32.mrf.mxu0 }
  0xfb   : >> { %v564_v45 = vpop.f32.mrf.mxu1 }
  0xfc   : >> { %v554_v46 = vpop.f32.mrf.mxu0 }
  0xfd   : >> { %v1643_v47 = vpop.f32.mrf.mxu1 }
  0xfe   : >> { %680 = vrot.lane.b32.xlu1 %v1643_v47, %s1914_s22 }
  0xff   : >> { %v655_v48 = vpop.f32.mrf.mxu1 }
 0x100   : >> { %678 = vrot.lane.b32.xlu0 %v655_v48, %s1914_s22  ;;  %v1653_v49 = vpop.f32.mrf.mxu0 }
 0x101   : >> { %v1646_v51 = vpop.f32.mrf.mxu1 }
 0x102   : >> { %797 = vrot.lane.b32.xlu1 %v1653_v49, %s1915_s16  ;;  %v772_v50 = vpop.f32.mrf.mxu0 }
 0x103   : >> { %v665_v52 = vpop.f32.mrf.mxu1 }
 0x104   : >> { %795 = vrot.lane.b32.xlu0 %v772_v50, %s1915_s16  ;;  %v1656_v53 = vpop.f32.mrf.mxu0 }
 0x106   : >> { %684 = vrot.lane.b32.xlu1 %v1646_v51, %s1914_s22  ;;  %v782_v54 = vpop.f32.mrf.mxu0 }
 0x108   : >> { %682 = vrot.lane.b32.xlu0 %v665_v52, %s1914_s22 }
 0x10a   : >> { %801 = vrot.lane.b32.xlu1 %v1656_v53, %s1915_s16 }
 0x10c   : >> { %799 = vrot.lane.b32.xlu0 %v782_v54, %s1915_s16 }
 0x170   : >> { %v681_v59 = vpop.permute.xlu1 %680 }
 0x171   : >> { %v691_v61 = vadd.f32 %v1633_v44, %v681_v59 }
 0x172   : >> { %v679_v60 = vpop.permute.xlu0 %678 }
 0x173   : >> { %v690_v63 = vadd.f32 %v679_v60, %v554_v46 }
 0x174   : >> { %v798_v62 = vpop.permute.xlu1 %797 }
 0x175   : >> { %v808_v0 = vadd.f32 %v798_v62, %v691_v61 }
 0x176   : >> { %v796_v35 = vpop.permute.xlu0 %795 }
 0x177   : >> { %v832_v36 = vadd.f32 %v819_v58, %v808_v0  ;;  %v807_v37 = vadd.f32 %v796_v35, %v690_v63 }
 0x178   : >> { %v685_v39 = vpop.permute.xlu1 %684 }
 0x179   : >> { %v836_v40 = vmax.f32 %v832_v36, 0.0  ;;  %v831_v41 = vadd.f32 %v814_v56, %v807_v37  ;;  %v693_v48 = vadd.f32 %v1636_v42, %v685_v39  ;;  %v1916_v42 = vmov (%p327_p13), 0.0  }
 0x17a   : >> { %v683_v43 = vpop.permute.xlu0 %682 }
 0x17b   : >> { %843 = vst.msk [vmem:[%s840_s14 + $0x8] sm:$0xff] %vm841_vm2, %v836_v40  ;;  %v835_v47 = vmax.f32 %v831_v41, 0.0  ;;  %v692_v44 = vadd.f32 %v683_v43, %v564_v45 }
 0x17c   : >> { %v802_v49 = vpop.permute.xlu1 %801 }
 0x17d   : >> { %842 = vst.msk [vmem:[%s840_s14] sm:$0xff] %vm841_vm2, %v835_v47  ;;  %v810_v46 = vadd.f32 %v802_v49, %v693_v48 }
 0x17e   : >> { %v800_v50 = vpop.permute.xlu0 %799 }
 0x17f   : >> { %v834_v51 = vadd.f32 %v829_v57, %v810_v46  ;;  %v809_v52 = vadd.f32 %v800_v50, %v692_v44 }
 0x181   : >> { %v838_v53 = vmax.f32 %v834_v51, 0.0  ;;  %v833_v54 = vadd.f32 %v824_v55, %v809_v52  ;;  %329 = sbr.rel (!%p327_p13) target bundleno = 34 (0x22), region = 110 }
 0x183   : >> { %845 = vst.msk [vmem:[%s840_s14 + $0x18] sm:$0xff] %vm841_vm2, %v838_v53  ;;  %v837_v58 = vmax.f32 %v833_v54, 0.0 }
 0x185   : >> { %844 = vst.msk [vmem:[%s840_s14 + $0x10] sm:$0xff] %vm841_vm2, %v837_v58 }
 0x186   : > { %847 = vst.msk [vmem:[#allocation2] sm:$0xff] %vm846_vm3, %v1916_v42  ;;  %848 = vst.msk [vmem:[#allocation2 + $0x8] sm:$0xff] %vm846_vm3, %v1916_v42 }
 0x187   : > { %849 = vst.msk [vmem:[#allocation2 + $0x10] sm:$0xff] %vm846_vm3, %v1916_v42  ;;  %850 = vst.msk [vmem:[#allocation2 + $0x18] sm:$0xff] %vm846_vm3, %v1916_v42 }
 0x188   : > { %851 = vst.msk [vmem:[#allocation2 + $0x20] sm:$0xff] %vm846_vm3, %v1916_v42  ;;  %852 = vst.msk [vmem:[#allocation2 + $0x28] sm:$0xff] %vm846_vm3, %v1916_v42 }
 0x189   : > { %853 = vst.msk [vmem:[#allocation2 + $0x30] sm:$0xff] %vm846_vm3, %v1916_v42  ;;  %854 = vst.msk [vmem:[#allocation2 + $0x38] sm:$0xff] %vm846_vm3, %v1916_v42 }
 0x18a   : > { %855 = vst.msk [vmem:[#allocation2 + $0x40] sm:$0xff] %vm846_vm3, %v1916_v42  ;;  %856 = vst.msk [vmem:[#allocation2 + $0x48] sm:$0xff] %vm846_vm3, %v1916_v42 }
 0x18b   : > { %857 = vst.msk [vmem:[#allocation2 + $0x50] sm:$0xff] %vm846_vm3, %v1916_v42  ;;  %858 = vst.msk [vmem:[#allocation2 + $0x58] sm:$0xff] %vm846_vm3, %v1916_v42 }
 0x18c   : > { %859 = vst.msk [vmem:[#allocation2 + $0x60] sm:$0xff] %vm846_vm3, %v1916_v42  ;;  %860 = vst.msk [vmem:[#allocation2 + $0x68] sm:$0xff] %vm846_vm3, %v1916_v42 }
 0x18d   : > { %861 = vst.msk [vmem:[#allocation2 + $0x70] sm:$0xff] %vm846_vm3, %v1916_v42  ;;  %862 = vst.msk [vmem:[#allocation2 + $0x78] sm:$0xff] %vm846_vm3, %v1916_v42 }
 0x18e   : > { %863 = vst.msk [vmem:[#allocation2 + $0x80] sm:$0xff] %vm846_vm3, %v1916_v42  ;;  %864 = vst.msk [vmem:[#allocation2 + $0x88] sm:$0xff] %vm846_vm3, %v1916_v42 }
 0x18f   : > { %865 = vst.msk [vmem:[#allocation2 + $0x90] sm:$0xff] %vm846_vm3, %v1916_v42  ;;  %866 = vst.msk [vmem:[#allocation2 + $0x98] sm:$0xff] %vm846_vm3, %v1916_v42 }
 0x190   : > { %867 = vst.msk [vmem:[#allocation2 + $0xa0] sm:$0xff] %vm846_vm3, %v1916_v42  ;;  %868 = vst.msk [vmem:[#allocation2 + $0xa8] sm:$0xff] %vm846_vm3, %v1916_v42 }
 0x191   : > { %869 = vst.msk [vmem:[#allocation2 + $0xb0] sm:$0xff] %vm846_vm3, %v1916_v42  ;;  %870 = vst.msk [vmem:[#allocation2 + $0xb8] sm:$0xff] %vm846_vm3, %v1916_v42 }
 0x192   : > { %871 = vst.msk [vmem:[#allocation2 + $0xc0] sm:$0xff] %vm846_vm3, %v1916_v42  ;;  %872 = vst.msk [vmem:[#allocation2 + $0xc8] sm:$0xff] %vm846_vm3, %v1916_v42 }
 0x193   : > { %873 = vst.msk [vmem:[#allocation2 + $0xd0] sm:$0xff] %vm846_vm3, %v1916_v42  ;;  %874 = vst.msk [vmem:[#allocation2 + $0xd8] sm:$0xff] %vm846_vm3, %v1916_v42 }
 0x194   : > { %875 = vst.msk [vmem:[#allocation2 + $0xe0] sm:$0xff] %vm846_vm3, %v1916_v42  ;;  %876 = vst.msk [vmem:[#allocation2 + $0xe8] sm:$0xff] %vm846_vm3, %v1916_v42 }
 0x195   : > { %877 = vst.msk [vmem:[#allocation2 + $0xf0] sm:$0xff] %vm846_vm3, %v1916_v42  ;;  %878 = vst.msk [vmem:[#allocation2 + $0xf8] sm:$0xff] %vm846_vm3, %v1916_v42 }
 0x196   : > { %879 = vst.msk [vmem:[#allocation2 + $0x100] sm:$0xff] %vm846_vm3, %v1916_v42  ;;  %880 = vst.msk [vmem:[#allocation2 + $0x108] sm:$0xff] %vm846_vm3, %v1916_v42 }
 0x197   : > { %881 = vst.msk [vmem:[#allocation2 + $0x110] sm:$0xff] %vm846_vm3, %v1916_v42  ;;  %882 = vst.msk [vmem:[#allocation2 + $0x118] sm:$0xff] %vm846_vm3, %v1916_v42 }
 0x198   : > { %883 = vst.msk [vmem:[#allocation2 + $0x120] sm:$0xff] %vm846_vm3, %v1916_v42  ;;  %884 = vst.msk [vmem:[#allocation2 + $0x128] sm:$0xff] %vm846_vm3, %v1916_v42 }
 0x199   : > { %885 = vst.msk [vmem:[#allocation2 + $0x130] sm:$0xff] %vm846_vm3, %v1916_v42  ;;  %886 = vst.msk [vmem:[#allocation2 + $0x138] sm:$0xff] %vm846_vm3, %v1916_v42 }
 0x19a   : > { %888 = vst.msk [vmem:[#allocation2] sm:$0xff] %vm887_vm4, %v1916_v42  ;;  %889 = vst.msk [vmem:[#allocation2 + $0x8] sm:$0xff] %vm887_vm4, %v1916_v42 }
 0x19b   : > { %890 = vst.msk [vmem:[#allocation2 + $0x10] sm:$0xff] %vm887_vm4, %v1916_v42  ;;  %891 = vst.msk [vmem:[#allocation2 + $0x18] sm:$0xff] %vm887_vm4, %v1916_v42 }
 0x19c   : > { %892 = vst.msk [vmem:[#allocation2 + $0x20] sm:$0xff] %vm887_vm4, %v1916_v42  ;;  %893 = vst.msk [vmem:[#allocation2 + $0x28] sm:$0xff] %vm887_vm4, %v1916_v42 }
 0x19d   : > { %894 = vst.msk [vmem:[#allocation2 + $0x30] sm:$0xff] %vm887_vm4, %v1916_v42  ;;  %895 = vst.msk [vmem:[#allocation2 + $0x38] sm:$0xff] %vm887_vm4, %v1916_v42 }
 0x19e   : > { %896 = vst.msk [vmem:[#allocation2 + $0x40] sm:$0xff] %vm887_vm4, %v1916_v42  ;;  %897 = vst.msk [vmem:[#allocation2 + $0x48] sm:$0xff] %vm887_vm4, %v1916_v42 }
 0x19f   : > { %898 = vst.msk [vmem:[#allocation2 + $0x50] sm:$0xff] %vm887_vm4, %v1916_v42  ;;  %899 = vst.msk [vmem:[#allocation2 + $0x58] sm:$0xff] %vm887_vm4, %v1916_v42 }
 0x1a0   : > { %900 = vst.msk [vmem:[#allocation2 + $0x60] sm:$0xff] %vm887_vm4, %v1916_v42  ;;  %901 = vst.msk [vmem:[#allocation2 + $0x68] sm:$0xff] %vm887_vm4, %v1916_v42 }
 0x1a1   : > { %902 = vst.msk [vmem:[#allocation2 + $0x70] sm:$0xff] %vm887_vm4, %v1916_v42  ;;  %903 = vst.msk [vmem:[#allocation2 + $0x78] sm:$0xff] %vm887_vm4, %v1916_v42 }
 0x1a2   : > { %904 = vst.msk [vmem:[#allocation2 + $0x80] sm:$0xff] %vm887_vm4, %v1916_v42  ;;  %905 = vst.msk [vmem:[#allocation2 + $0x88] sm:$0xff] %vm887_vm4, %v1916_v42 }
 0x1a3   : > { %906 = vst.msk [vmem:[#allocation2 + $0x90] sm:$0xff] %vm887_vm4, %v1916_v42  ;;  %907 = vst.msk [vmem:[#allocation2 + $0x98] sm:$0xff] %vm887_vm4, %v1916_v42 }
 0x1a4   : > { %908 = vst.msk [vmem:[#allocation2 + $0xa0] sm:$0xff] %vm887_vm4, %v1916_v42  ;;  %909 = vst.msk [vmem:[#allocation2 + $0xa8] sm:$0xff] %vm887_vm4, %v1916_v42 }
 0x1a5   : > { %910 = vst.msk [vmem:[#allocation2 + $0xb0] sm:$0xff] %vm887_vm4, %v1916_v42  ;;  %911 = vst.msk [vmem:[#allocation2 + $0xb8] sm:$0xff] %vm887_vm4, %v1916_v42 }
 0x1a6   : > { %912 = vst.msk [vmem:[#allocation2 + $0xc0] sm:$0xff] %vm887_vm4, %v1916_v42  ;;  %913 = vst.msk [vmem:[#allocation2 + $0xc8] sm:$0xff] %vm887_vm4, %v1916_v42 }
 0x1a7   : > { %914 = vst.msk [vmem:[#allocation2 + $0xd0] sm:$0xff] %vm887_vm4, %v1916_v42  ;;  %915 = vst.msk [vmem:[#allocation2 + $0xd8] sm:$0xff] %vm887_vm4, %v1916_v42 }
 0x1a8   : > { %916 = vst.msk [vmem:[#allocation2 + $0xe0] sm:$0xff] %vm887_vm4, %v1916_v42  ;;  %917 = vst.msk [vmem:[#allocation2 + $0xe8] sm:$0xff] %vm887_vm4, %v1916_v42 }
 0x1a9   : > { %918 = vst.msk [vmem:[#allocation2 + $0xf0] sm:$0xff] %vm887_vm4, %v1916_v42  ;;  %919 = vst.msk [vmem:[#allocation2 + $0xf8] sm:$0xff] %vm887_vm4, %v1916_v42  ;;  %931 = sbr.rel (%p1536_p0) target bundleno = 433 (0x1b1), region = 59 }
 0x1aa   : > { %920 = vst.msk [vmem:[#allocation2 + $0x100] sm:$0xff] %vm887_vm4, %v1916_v42  ;;  %921 = vst.msk [vmem:[#allocation2 + $0x108] sm:$0xff] %vm887_vm4, %v1916_v42 }
 0x1ab   : > { %922 = vst.msk [vmem:[#allocation2 + $0x110] sm:$0xff] %vm887_vm4, %v1916_v42  ;;  %923 = vst.msk [vmem:[#allocation2 + $0x118] sm:$0xff] %vm887_vm4, %v1916_v42 }
 0x1ac   : > { %924 = vst.msk [vmem:[#allocation2 + $0x120] sm:$0xff] %vm887_vm4, %v1916_v42  ;;  %925 = vst.msk [vmem:[#allocation2 + $0x128] sm:$0xff] %vm887_vm4, %v1916_v42 }
 0x1ad   : > { %926 = vst.msk [vmem:[#allocation2 + $0x130] sm:$0xff] %vm887_vm4, %v1916_v42  ;;  %927 = vst.msk [vmem:[#allocation2 + $0x138] sm:$0xff] %vm887_vm4, %v1916_v42 }
 0x1ae   : > { %v1917_v1 = vmov 0.0  }
 0x1af   : > { %933 = vst.msk [vmem:[#allocation2] sm:$0xff] %vm841_vm2, %v1917_v1  ;;  %934 = vst.msk [vmem:[#allocation2 + $0x8] sm:$0xff] %vm841_vm2, %v1917_v1 }
 0x1b0   : > { %935 = vst.msk [vmem:[#allocation2 + $0x10] sm:$0xff] %vm841_vm2, %v1917_v1  ;;  %936 = vst.msk [vmem:[#allocation2 + $0x18] sm:$0xff] %vm841_vm2, %v1917_v1 }
 0x1b1 PF: > { %p1537_p1 = scmp.ne.s32.totalorder %s2572_s25, 1 }
 0x1b3   : > { %940 = sbr.rel (%p1537_p1) target bundleno = 443 (0x1bb), region = 63 }
 0x1b8   : > { %v1918_v2 = vmov 0.0  }
 0x1b9   : > { %943 = vst.msk [vmem:[#allocation2 + $0x120] sm:$0xff] %vm841_vm2, %v1918_v2  ;;  %944 = vst.msk [vmem:[#allocation2 + $0x128] sm:$0xff] %vm841_vm2, %v1918_v2 }
 0x1ba   : > { %945 = vst.msk [vmem:[#allocation2 + $0x130] sm:$0xff] %vm841_vm2, %v1918_v2  ;;  %946 = vst.msk [vmem:[#allocation2 + $0x138] sm:$0xff] %vm841_vm2, %v1918_v2 }
 0x1bb PF: > { %s2427_s18 = smov 0  }
 0x1bc LB: >> { %vm967_vm5 = vcmask 785408   ;;  %s1538_s25 = sshll.u32 %s1910_s18, 5  ;;  %v1919_v3 = vmov 0   ;;  %s1920_s15 = smov 127   ;;  %v1921_v61 = vmov 0.0   ;;  %vm1922_vm6 = vmmov 0   ;;  %s1910_s18 = sphi %s2427_s18, %s952_s18  }
 0x1bd   : >> { %1681 = vmatprep.mubr.msk.f32.mxu0 %vm967_vm5, %v2109_v17  ;;  %1711 = vmatprep.mubr.msk.f32.mxu1 %vm967_vm5, %v2129_v21  ;;  %s2439_s10 = scalar_lea.vmem [#allocation2], %s1538_s25  ;;  %s1923_s17 = smov 126   ;;  %vm1340_vm7 = vcmask 261120   ;;  %vm1415_vm8 = vcmask 122880  }
 0x1be   : >> { %1832 = vset.pattern.permute.xlu0 %v1919_v3  ;;  %1833 = vset.pattern.permute.xlu1 %v1919_v3  ;;  %s1414_s19 = scalar_lea.vmem %s273_s23, %s1910_s18 [#allocation4]  ;;  %s952_s18 = sadd.s32 1, %s1910_s18  }
 0x1bf   : >> { %1320 = vperm.xlu0 %1832, %v2191_v32   ;;  %1315 = vperm.xlu1 %1833, %v2186_v31   ;;  %p949_p2 = scmp.ge.s32.totalorder %s952_s18, 8  }
 0x1c0   : > { %s1553_s30 = sshll.u32 (%p949_p2), %s1989_s6, 7  ;;  %s1431_s16 = sshll.u32 (%p949_p2), %s273_s23, 4  ;;  %s1432_s16 = int_to_ptr.vmem [resolvable:$true] %s1431_s16 }
 0x1c1   : >> { %v2442_v4 = vld [vmem:[%s2439_s10 + $0x58] sm:$0xff]  ;;  %v2445_v5 = vld [vmem:[%s2439_s10 + $0x50] sm:$0xff]  ;;  %v2452_v6 = vld [vmem:[%s2439_s10 + $0x48] sm:$0xff]  ;;  %s1429_s22 = scalar_lea.hbm (%p949_p2), %s2560_s7, %s1553_s30  ;;  %s2564_s9 = sand.u32 (%p949_p2), 1, %s1894_s27  }
 0x1c2   : >> { %1657 = vmatprep.subr.mxu0 %v2442_v4  ;;  %1687 = vmatprep.subr.mxu1 %v2442_v4  ;;  %v2459_v7 = vld [vmem:[%s2439_s10 + $0x40] sm:$0xff]  ;;  %v962_v8 = vld [vmem:[%s2439_s10 + $0x38] sm:$0xff]  ;;  %v961_v9 = vld [vmem:[%s2439_s10 + $0x30] sm:$0xff]  ;;  %s1418_s14 = scalar_lea.sflag (%p949_p2), [#allocation5], %s2564_s9  ;;  %s1834_s25 = scalar_lea.vmem (%p949_p2), %s1432_s16, 128 }
 0x1c3   : >> { %1658 = vmatpush3.msra.mxu0 %v2442_v4  ;;  %1688 = vmatpush3.msra.mxu1 %v2442_v4  ;;  %v960_v10 = vld [vmem:[%s2439_s10 + $0x28] sm:$0xff]  ;;  %v959_v11 = vld [vmem:[%s2439_s10 + $0x20] sm:$0xff]  ;;  %v958_v12 = vld [vmem:[%s2439_s10 + $0x18] sm:$0xff]  ;;  %p1835_p3 = scmp.ne.s32.totalorder (%p949_p2), %s1432_s16, %s1834_s25  ;;  %s1924_s18 = smov (%p949_p2), [#allocation4]  }
 0x1c4   : >> { %1659 = vmatprep.subr.mxu0 %v2445_v5  ;;  %1689 = vmatprep.subr.mxu1 %v2445_v5  ;;  %v957_v13 = vld [vmem:[%s2439_s10 + $0x10] sm:$0xff]  ;;  %v956_v14 = vld [vmem:[%s2439_s10 + $0x8] sm:$0xff]  ;;  %v955_v15 = vld [vmem:[%s2439_s10] sm:$0xff]  ;;  %s1838_s10 = sshll.u32 (%p949_p2), %s1924_s18, 4  ;;  %s1839_s10 = int_to_ptr.vmem [resolvable:$false] %s1838_s10 }
 0x1c5   : >> { %1660 = vmatpush3.msra.mxu0 %v2445_v5  ;;  %1690 = vmatpush3.msra.mxu1 %v2445_v5  ;;  %p1836_p4 = pnand (%p949_p2), %p1835_p3, %p2006_p5  ;;  %p1841_p8 = scmp.lt.s32.totalorder (%p949_p2), %s1432_s16, %s1839_s10 }
 0x1c6   : >> { %1661 = vmatprep.subr.mxu0 %v2452_v6  ;;  %1691 = vmatprep.subr.mxu1 %v2452_v6 }
 0x1c7   : >> { %1662 = vmatpush3.msra.mxu0 %v2452_v6  ;;  %1692 = vmatpush3.msra.mxu1 %v2452_v6  ;;  %p1837_p7 = pneg (%p949_p2), %p1836_p4 }
 0x1c8   : >> { %1663 = vmatprep.subr.mxu0 %v2459_v7  ;;  %1693 = vmatprep.subr.mxu1 %v2459_v7 }
 0x1c9   : >> { %1664 = vmatpush3.msra.mxu0 %v2459_v7  ;;  %1694 = vmatpush3.msra.mxu1 %v2459_v7 }
 0x1ca   : >> { %1665 = vmatprep.subr.mxu0 %v962_v8  ;;  %1695 = vmatprep.subr.mxu1 %v962_v8 }
 0x1cb   : >> { %1666 = vmatpush3.msra.mxu0 %v962_v8  ;;  %1696 = vmatpush3.msra.mxu1 %v962_v8 }
 0x1cc   : >> { %1667 = vmatprep.subr.mxu0 %v961_v9  ;;  %1697 = vmatprep.subr.mxu1 %v961_v9 }
 0x1cd   : >> { %1668 = vmatpush3.msra.mxu0 %v961_v9  ;;  %1698 = vmatpush3.msra.mxu1 %v961_v9 }
 0x1ce   : >> { %1669 = vmatprep.subr.mxu0 %v960_v10  ;;  %1699 = vmatprep.subr.mxu1 %v960_v10 }
 0x1cf   : >> { %1670 = vmatpush3.msra.mxu0 %v960_v10  ;;  %1700 = vmatpush3.msra.mxu1 %v960_v10 }
 0x1d0   : >> { %1671 = vmatprep.subr.mxu0 %v959_v11  ;;  %1701 = vmatprep.subr.mxu1 %v959_v11 }
 0x1d1   : >> { %1672 = vmatpush3.msra.mxu0 %v959_v11  ;;  %1702 = vmatpush3.msra.mxu1 %v959_v11 }
 0x1d2   : >> { %1673 = vmatprep.subr.mxu0 %v958_v12  ;;  %1703 = vmatprep.subr.mxu1 %v958_v12 }
 0x1d3   : >> { %1674 = vmatpush3.msra.mxu0 %v958_v12  ;;  %1704 = vmatpush3.msra.mxu1 %v958_v12 }
 0x1d4   : >> { %1675 = vmatprep.subr.mxu0 %v957_v13  ;;  %1705 = vmatprep.subr.mxu1 %v957_v13 }
 0x1d5   : >> { %1676 = vmatpush3.msra.mxu0 %v957_v13  ;;  %1706 = vmatpush3.msra.mxu1 %v957_v13 }
 0x1d6   : >> { %1677 = vmatprep.subr.mxu0 %v956_v14  ;;  %1707 = vmatprep.subr.mxu1 %v956_v14 }
 0x1d7   : >> { %1678 = vmatpush3.msra.mxu0 %v956_v14  ;;  %1708 = vmatpush3.msra.mxu1 %v956_v14 }
 0x1d8   : >> { %1679 = vmatprep.subr.mxu0 %v955_v15  ;;  %1709 = vmatprep.subr.mxu1 %v955_v15 }
 0x1d9   : >> { %1680 = vmatpush3.msra.mxu0 %v955_v15  ;;  %1710 = vmatpush3.msra.mxu1 %v955_v15 }
 0x1da   : >> { %1682 = vmatmul.mubr.msk.f32.vlgmr.msra.gmra.mxu0 %vm967_vm5, %v2114_v18  ;;  %1712 = vmatmul.mubr.msk.f32.vlgmr.msra.gmra.mxu1 %vm967_vm5, %v2139_v22 }
 0x1db   : >> { %1717 = vmatprep.subr.mxu0 %v2442_v4  ;;  %1714 = vmatprep.mubr.msk.f32.mxu1 %vm967_vm5, %v2144_v23 }
 0x1dc   : >> { %1718 = vmatpush3.msra.mxu0 %v2442_v4  ;;  %1684 = vmatprep.mubr.msk.f32.mxu0 %vm967_vm5, %v2119_v19 }
 0x1dd   : >> { %1719 = vmatprep.subr.mxu0 %v2445_v5  ;;  %1305 = vperm.xlu0 %1832, %v2176_v29  }
 0x1de   : >> { %1720 = vmatpush3.msra.mxu0 %v2445_v5  ;;  %1715 = vmatmul.mubr.msk.f32.gmra.mxu1 %vm967_vm5, %v2149_v24 }
 0x1df   : >> { %1721 = vmatprep.subr.mxu0 %v2452_v6  ;;  %1685 = vmatmul.mubr.msk.f32.gmra.mxu0 %vm967_vm5, %v2124_v20 }
 0x1e0   : >> { %1722 = vmatpush3.msra.mxu0 %v2452_v6  ;;  %1741 = vmatprep.mubr.msk.f32.mxu0 %vm967_vm5, %v2156_v25 }
 0x1e1   : >> { %1723 = vmatprep.subr.mxu0 %v2459_v7  ;;  %1310 = vperm.xlu1 %1833, %v2181_v30  }
 0x1e2   : >> { %1724 = vmatpush3.msra.mxu0 %v2459_v7  ;;  %1747 = vmatprep.subr.mxu1 %v1921_v61 }
 0x1e3   : >> { %1725 = vmatprep.subr.mxu0 %v962_v8  ;;  %1755 = vmatprep.mubr.msk.f32.mxu1 %vm1922_vm6, %v1921_v61 }
 0x1e4   : >> { %1726 = vmatpush3.msra.mxu0 %v962_v8 }
 0x1e5   : >> { %1727 = vmatprep.subr.mxu0 %v961_v9 }
 0x1e6   : >> { %1728 = vmatpush3.msra.mxu0 %v961_v9 }
 0x1e7   : >> { %1729 = vmatprep.subr.mxu0 %v960_v10 }
 0x1e8   : >> { %1730 = vmatpush3.msra.mxu0 %v960_v10 }
 0x1e9   : >> { %1731 = vmatprep.subr.mxu0 %v959_v11 }
 0x1ea   : >> { %1732 = vmatpush3.msra.mxu0 %v959_v11 }
 0x1eb   : >> { %1733 = vmatprep.subr.mxu0 %v958_v12 }
 0x1ec   : >> { %1734 = vmatpush3.msra.mxu0 %v958_v12  ;;  %v1338_v12 = vsub.s32 0, %v2213_v38 }
 0x1ed   : >> { %1735 = vmatprep.subr.mxu0 %v957_v13 }
 0x1ee   : >> { %1736 = vmatpush3.msra.mxu0 %v957_v13 }
 0x1ef   : >> { %1737 = vmatprep.subr.mxu0 %v956_v14 }
 0x1f0   : >> { %1738 = vmatpush3.msra.mxu0 %v956_v14 }
 0x1f1   : >> { %1739 = vmatprep.subr.mxu0 %v955_v15 }
 0x1f2   : >> { %1740 = vmatpush3.msra.mxu0 %v955_v15 }
 0x1f3   : >> { %1742 = vmatmul.mubr.msk.f32.vlgmr.msra.gmra.mxu0 %vm967_vm5, %v2161_v26 }
 0x1f4   : >> { %1744 = vmatprep.mubr.msk.f32.mxu0 %vm967_vm5, %v2166_v27 }
 0x1f7   : >> { %1745 = vmatmul.mubr.msk.f32.gmra.mxu0 %vm967_vm5, %v2171_v28 }
 0x23a   : >> { %v1321_v37 = vpop.permute.xlu0 %1320  ;;  %v1316_v39 = vpop.permute.xlu1 %1315 }
 0x258   : >> { %v1306_v40 = vpop.permute.xlu0 %1305 }
 0x25c   : >> { %v1311_v41 = vpop.permute.xlu1 %1310 }
 0x29a   : >> { %v1713_v16 = vpop.f32.mrf.mxu1  ;;  %v1683_v57 = vpop.f32.mrf.mxu0 }
 0x29b   : >> { %1172 = vrot.lane.b32.xlu0 %v1713_v16, %s1920_s15 }
 0x29c   : >> { %v1147_v45 = vpop.f32.mrf.mxu1  ;;  %v1046_v59 = vpop.f32.mrf.mxu0 }
 0x29d   : >> { %1170 = vrot.lane.b32.xlu1 %v1147_v45, %s1920_s15 }
 0x29e   : >> { %v1716_v55 = vpop.f32.mrf.mxu1 }
 0x29f   : >> { %1176 = vrot.lane.b32.xlu0 %v1716_v55, %s1920_s15  ;;  %v1686_v60 = vpop.f32.mrf.mxu0 }
 0x2a0   : >> { %v1157_v56 = vpop.f32.mrf.mxu1 }
 0x2a1   : >> { %1174 = vrot.lane.b32.xlu1 %v1157_v56, %s1920_s15  ;;  %v1056_v62 = vpop.f32.mrf.mxu0  ;;  %s1840_s15 = scalar_lea.vmem (%p949_p2), %s1839_s10, 256 }
 0x2a2   : > { %p1842_p9 = scmp.lt.s32.totalorder (%p949_p2), %s1840_s15, %s1834_s25 }
 0x2a4   : > { %p1843_p10 = por (%p949_p2), %p1842_p9, %p1841_p8 }
 0x2a6   : > { %p1844_p11 = pnand (%p949_p2), %p1843_p10, %p1837_p7 }
 0x2b3   : >> { %v1743_v63 = vpop.f32.mrf.mxu0 }
 0x2b5   : >> { %v1264_v0 = vpop.f32.mrf.mxu0 }
 0x2b7   : >> { %v1746_v35 = vpop.f32.mrf.mxu0 }
 0x2b8   : >> { %1293 = vrot.lane.b32.xlu0 %v1746_v35, %s1923_s17 }
 0x2b9   : >> { %v1274_v36 = vpop.f32.mrf.mxu0 }
 0x2ba   : >> { %1291 = vrot.lane.b32.xlu1 %v1274_v36, %s1923_s17 }
 0x2bc   : >> { %1289 = vrot.lane.b32.xlu0 %v1743_v63, %s1923_s17 }
 0x2be   : >> { %1287 = vrot.lane.b32.xlu1 %v1264_v0, %s1923_s17 }
 0x2c0   : >> { %1333 = vperm.xlu0 %1832, %v2198_v34  }
 0x30d   : >> { %v1173_v43 = vpop.permute.xlu0 %1172 }
 0x30e   : >> { %v1183_v53 = vadd.f32 %v1683_v57, %v1173_v43 }
 0x30f   : >> { %v1171_v47 = vpop.permute.xlu1 %1170 }
 0x310   : >> { %v1182_v1 = vadd.f32 %v1171_v47, %v1046_v59 }
 0x311   : >> { %v1177_v48 = vpop.permute.xlu0 %1176 }
 0x312   : >> { %v1185_v44 = vadd.f32 %v1686_v60, %v1177_v48 }
 0x313   : >> { %v1175_v49 = vpop.permute.xlu1 %1174 }
 0x314   : >> { %v1184_v50 = vadd.f32 %v1175_v49, %v1056_v62 }
 0x32a   : >> { %v1294_v46 = vpop.permute.xlu0 %1293 }
 0x32b   : >> { %v1302_v51 = vadd.f32 %v1294_v46, %v1185_v44 }
 0x32c   : >> { %v1292_v52 = vpop.permute.xlu1 %1291 }
 0x32d   : >> { %v1326_v54 = vadd.f32 %v1321_v37, %v1302_v51  ;;  %v1301_v58 = vadd.f32 %v1292_v52, %v1184_v50 }
 0x32e   : >> { %v1290_v42 = vpop.permute.xlu0 %1289 }
 0x32f   : >> { %v1330_v2 = vmax.f32 %v1326_v54, 0.0  ;;  %v1325_v3 = vadd.f32 %v1316_v39, %v1301_v58  ;;  %v1300_v4 = vadd.f32 %v1290_v42, %v1183_v53 }
 0x330   : >> { %v1288_v5 = vpop.permute.xlu1 %1287 }
 0x331   : >> { %v1329_v6 = vmax.f32 %v1325_v3, 0.0  ;;  %v1324_v7 = vadd.f32 %v1311_v41, %v1300_v4  ;;  %v1299_v8 = vadd.f32 %v1288_v5, %v1182_v1  ;;  %1748 = vmatpush3.msra.mxu1 %v1330_v2 }
 0x332   : >> { %1749 = vmatprep.subr.mxu1 %v1921_v61 }
 0x333   : >> { %v1328_v9 = vmax.f32 %v1324_v7, 0.0  ;;  %v1323_v10 = vadd.f32 %v1306_v40, %v1299_v8  ;;  %1750 = vmatpush3.msra.mxu1 %v1329_v6 }
 0x334   : >> { %1751 = vmatprep.subr.mxu1 %v1921_v61 }
 0x335   : >> { %v1327_v11 = vmax.f32 %v1323_v10, 0.0  ;;  %1752 = vmatpush3.msra.mxu1 %v1328_v9 }
 0x336   : >> { %1753 = vmatprep.subr.mxu1 %v1921_v61 }
 0x337   : >> { %1754 = vmatpush3.msra.mxu1 %v1327_v11 }
 0x338   : >> { %1756 = vmatmul.mubr.msk.f32.vlgmr.msra.gmra.mxu1 %vm1340_vm7, %v2196_v33 }
 0x33b   : >> { %v1334_v13 = vpop.permute.xlu0 %1333 }
 0x33c   : >> { %v1339_v14 = vrot.slane %v1334_v13, %v1338_v12 }
 0x3f7   : > { %951 = sbr.rel (!%p949_p2) target bundleno = 444 (0x1bc), region = 121 }
 0x3f8   : >> { %v1410_v15 = vpop.f32.mrf.mxu1 }
 0x3f9   : >> { %v1411_v16 = vadd.f32 %v1410_v15, %v1339_v14 }
 0x3fa   : >> { %v1757_v45 = vpop.f32.mrf.mxu1 }
 0x3fb   : >> { %1416 = vst.msk [vmem:[%s1414_s19] sm:$0x1] %vm1415_vm8, %v1411_v16 }
 0x3fc   : > { %1847 = shalt.err (!%p1844_p11)
}
 0x3fd   : > { %s1848_s6 = scalar_lea.hbm %s1429_s22, 128  ;;  %s1852_s17 = scalar_lea.hbm %s2560_s7, 512 }
 0x3fe   : > { %p1849_p12 = scmp.ne.s32.totalorder %s1429_s22, %s1848_s6  ;;  %p1853_p1 = scmp.lt.s32.totalorder %s1429_s22, %s2560_s7 }
 0x3ff   : > { %p1854_p2 = scmp.lt.s32.totalorder %s1852_s17, %s1848_s6 }
 0x400   : > { %p1850_p13 = pnand %p1849_p12, %p2006_p5 }
 0x401   : > { %p1855_p3 = por %p1854_p2, %p1853_p1 }
 0x402   : > { %p1851_p0 = pneg %p1850_p13 }
 0x404   : > { %p1856_p4 = pnand %p1855_p3, %p1851_p0 }
 0x406   : > { %1859 = shalt.err (!%p1856_p4)
}
 0x407   : > { %1763 = dma.vmem_to_hbm [thread:$0]  (%p2006_p5), %s1432_s16, 128, %s1429_s22, %s1418_s14  }
 0x408 PF: > { %p1769_p7 = scmp.ge.s32.totalorder %s1902_s29, 2  ;;  %s1443_s20 = sand.u32 1, %s1890_s26  }
 0x409   : > { %s1444_s24 = scalar_lea.sflag [#allocation5], %s1443_s20 }
 0x40a   : > { %p1766_p8 = pnand %p1769_p7, %p2010_p6 }
 0x40c   : > { %p1767_p9 = pneg %p1766_p8 }
 0x40e   : > { %1885 = dma.done.wait (%p1767_p9), %s1444_s24, 128  }
 0x40f   : > { %1887 = vsyncadd (%p1767_p9), %s1444_s24, 4294967168  ;;  %p19_p10 = scmp.ge.s32.totalorder %s1993_s8, 6   ;;  %s2565_s26 = smov %s1894_s27 }
 0x410   : > { %s2566_s27 = smov %s1898_s28  ;;  %s2567_s28 = smov %s2004_s11 }
 0x411   : > { %s2568_s29 = smov %s1993_s8  ;;  %21 = sbr.rel (!%p19_p10) target bundleno = 6 (0x6), region = 132 }
 0x416   :  { %1449 = vsyncpa [#allocation5], 1 }
 0x417   :  { %1451 = vsyncpa [#allocation5 + $0x1], 1 }

</bundles_post_ra>
